<compile_context>
chip_gen: v5e
topology: v5e:2x2
jax: 0.10.0
libtpu: 0.0.40
codegen_flags: <defaults>
</compile_context>

<pallas_src>
import functools

import jax
import jax.numpy as jnp
from jax.experimental import pallas as pl
from jax.experimental.pallas import tpu as pltpu

LANES = 128
STRIPE_ROWS = 512   # single-pass stripe: 512x128 f32 = 256 KiB per input


def _tensorcore_count():
    """TensorCores per chip (2 on megacore-style chips, else 1). Best-effort."""
    try:
        info = pltpu.get_tpu_info()
        for attr in ("num_tensorcores", "tensorcore_count", "num_cores",
                     "num_tensor_cores", "cores_per_chip", "num_cores_per_chip"):
            v = getattr(info, attr, None)
            if isinstance(v, int) and v >= 1:
                return min(int(v), 2)
    except Exception:
        pass
    return 1


def _input_vmem_budget_bytes():
    """Byte budget for the double-buffered input tiles (2 inputs x 2 buffers).

    Kept comfortably under each generation's *default* scoped-VMEM limit
    (v5e: 16 MiB, v6e/v7x: 32 MiB) so no vmem_limit override is needed; the
    single-pass body only adds stripe-sized (<2 MiB) temporaries on top.
    """
    try:
        kind = jax.devices()[0].device_kind.lower()
    except Exception:
        kind = ""
    if "v6" in kind or "v7" in kind:
        return 16 << 20
    return 8 << 20   # conservative (v5e-safe) default


def _stripe_update(p_ref, t_ref, acc_ref, row_start, rows, valid_rem):
    """Load one stripe once, cast+sigmoid, optionally mask, accumulate."""
    p = jax.nn.sigmoid(p_ref[pl.ds(row_start, rows), :].astype(jnp.float32))
    t = t_ref[pl.ds(row_start, rows), :].astype(jnp.float32)
    if valid_rem is not None:
        # Stripe-local flat index (< 2^16) vs. remaining valid-element count.
        row = jax.lax.broadcasted_iota(jnp.int32, (rows, LANES), 0)
        lane = jax.lax.broadcasted_iota(jnp.int32, (rows, LANES), 1)
        valid = row * LANES + lane < valid_rem
        p = jnp.where(valid, p, 0.0)
        t = jnp.where(valid, t, 0.0)
    pr = p.reshape(rows // 8, 8, LANES)
    tr = t.reshape(rows // 8, 8, LANES)
    acc_ref[0] += jnp.sum(pr * tr, axis=0)   # intersection
    acc_ref[1] += jnp.sum(pr, axis=0)        # sum(sigmoid(predict))
    acc_ref[2] += jnp.sum(tr, axis=0)        # sum(target)


def _block_pass(p_ref, t_ref, acc_ref, block_rows, valid_rem):
    """Single pass over the whole block in STRIPE_ROWS-row stripes."""
    n_full = block_rows // STRIPE_ROWS
    rem_rows = block_rows - n_full * STRIPE_ROWS   # static, multiple of 8
    if n_full > 0:
        def body(s, carry):
            start = pl.multiple_of(s * STRIPE_ROWS, STRIPE_ROWS)
            vr = (None if valid_rem is None
                  else valid_rem - s * (STRIPE_ROWS * LANES))
            _stripe_update(p_ref, t_ref, acc_ref, start, STRIPE_ROWS, vr)
            return carry
        jax.lax.fori_loop(0, n_full, body, 0)
    if rem_rows > 0:
        vr = (None if valid_rem is None
              else valid_rem - n_full * (STRIPE_ROWS * LANES))
        _stripe_update(p_ref, t_ref, acc_ref, n_full * STRIPE_ROWS, rem_rows, vr)


def _dice_partials_kernel(p_ref, t_ref, out_ref, acc_ref, *,
                          block_rows, tiles_per_core, num_cores,
                          full_blocks, tail_valid, needs_mask):
    if num_cores > 1:
        red_ax = 1
        blk = pl.program_id(0) * tiles_per_core + pl.program_id(1)
    else:
        red_ax = 0
        blk = pl.program_id(0)
    step = pl.program_id(red_ax)

    @pl.when(step == 0)
    def _():
        acc_ref[...] = jnp.zeros_like(acc_ref)

    # Fast path: blocks that are entirely valid (no padded / OOB elements).
    if full_blocks > 0:
        if needs_mask:
            @pl.when(blk < full_blocks)
            def _():
                _block_pass(p_ref, t_ref, acc_ref, block_rows, None)
        else:
            _block_pass(p_ref, t_ref, acc_ref, block_rows, None)

    # Masked path: only the ragged-tail block (blk == full_blocks) contributes
    # anything; clamped-duplicate / padded blocks are fully masked out.
    if needs_mask:
        @pl.when(blk >= full_blocks)
        def _():
            rem = jnp.where(blk == full_blocks, tail_valid, 0).astype(jnp.int32)
            _block_pass(p_ref, t_ref, acc_ref, block_rows, rem)

    @pl.when(step == pl.num_programs(red_ax) - 1)
    def _():
        out_ref[0, 0] = jnp.sum(acc_ref[0])
        out_ref[0, 1] = jnp.sum(acc_ref[1])
        out_ref[0, 2] = jnp.sum(acc_ref[2])


def dice_loss(predict, target, smooth=1.0):
    """Pallas TPU DiceLoss forward.  Returns a float32 scalar."""
    n = predict.size
    p_flat = predict.reshape(-1)   # keep native dtype in HBM; cast in-kernel
    t_flat = target.reshape(-1)

    rows = -(-n // LANES)
    rows8 = ((rows + 7) // 8) * 8
    n_slab = rows8 * LANES
    if n_slab != n:
        # < 1024-element zero pad just to form the (rows8, 128) slab; the pad
        # is masked in-kernel so its contents never reach the sums.
        p_flat = jnp.pad(p_flat, (0, n_slab - n))
        t_flat = jnp.pad(t_flat, (0, n_slab - n))
    p2d = p_flat.reshape(rows8, LANES)
    t2d = t_flat.reshape(rows8, LANES)

    # --- block sizing from a per-generation VMEM byte budget ----------------
    bytes_per_row = LANES * (jnp.dtype(p2d.dtype).itemsize
                             + jnp.dtype(t2d.dtype).itemsize)
    budget_rows = _input_vmem_budget_bytes() // (2 * bytes_per_row)  # 2 bufs
    budget_rows = max(STRIPE_ROWS, (budget_rows // STRIPE_ROWS) * STRIPE_ROWS)
    block_rows = min(budget_rows, rows8)           # always a multiple of 8
    block_elems = block_rows * LANES
    nrb = -(-rows8 // block_rows)                  # real row-blocks in slab

    num_cores = _tensorcore_count()
    if num_cores > 1 and nrb > 1:
        tpc = -(-nrb // num_cores)                 # row-blocks per core
        grid = (num_cores, tpc)
    else:
        num_cores, tpc = 1, nrb
        grid = (nrb,)

    covered = num_cores * tpc * block_elems
    needs_mask = covered != n
    full_blocks = n // block_elems                 # fully-valid leading blocks
    tail_valid = n - full_blocks * block_elems     # valid elems in tail block
    # Padding / ragged tail / clamped duplicates must always imply masking.
    assert needs_mask or (covered == n == n_slab), (n, n_slab, covered)

    if num_cores > 1:
        def row_block(c, i):
            # Clamp so every DMA stays in range; clamped duplicates have
            # logical blk >= full_blocks and are fully masked in-kernel.
            return (jnp.minimum(c * tpc + i, nrb - 1), 0)
        out_shape = jax.ShapeDtypeStruct((num_cores, 3), jnp.float32)
        out_spec = pl.BlockSpec((1, 3), lambda c, i: (c, 0),
                                memory_space=pltpu.SMEM)
        # TODO(synk): on v7x, switch this axis to pltpu.CORE_PARALLEL (or a
        # pl.core_map over create_tensorcore_mesh) once cross-TC sharding of
        # plain "parallel" axes is confirmed there.
        dims = ("parallel", "arbitrary")
    else:
        def row_block(i):
            return (i, 0)
        out_shape = jax.ShapeDtypeStruct((1, 3), jnp.float32)
        out_spec = pl.BlockSpec((1, 3), lambda i: (0, 0),
                                memory_space=pltpu.SMEM)
        dims = ("arbitrary",)

    kernel = functools.partial(
        _dice_partials_kernel, block_rows=block_rows, tiles_per_core=tpc,
        num_cores=num_cores, full_blocks=full_blocks, tail_valid=tail_valid,
        needs_mask=needs_mask)

    partials = pl.pallas_call(
        kernel,
        out_shape=out_shape,
        grid_spec=pltpu.PrefetchScalarGridSpec(
            num_scalar_prefetch=0,
            grid=grid,
            in_specs=[pl.BlockSpec((block_rows, LANES), row_block),
                      pl.BlockSpec((block_rows, LANES), row_block)],
            out_specs=out_spec,
            scratch_shapes=[pltpu.VMEM((3, 8, LANES), jnp.float32)],
        ),
        compiler_params=pltpu.CompilerParams(dimension_semantics=dims),
    )(p2d, t2d)

    sums = jnp.sum(partials, axis=0)   # combine per-core partials (tiny)
    dice = (2.0 * sums[0] + smooth) / (sums[1] + sums[2] + smooth)
    return (1.0 - dice).astype(jnp.float32)


def dice_loss_ref(predict, target, smooth=1.0):
    p = jax.nn.sigmoid(predict.astype(jnp.float32)).reshape(-1)
    t = target.astype(jnp.float32).reshape(-1)
    inter = jnp.sum(p * t)
    dice = (2.0 * inter + smooth) / (jnp.sum(p) + jnp.sum(t) + smooth)
    return 1.0 - dice


if __name__ == "__main__":
    key = jax.random.PRNGKey(0)
    k1, k2, k3, k4 = jax.random.split(key, 4)

    # layout: NCHW, binary segmentation (logits + {0,1} mask)
    B, C, H, W = 2, 4, 16, 16
    predict = jax.random.normal(k1, (B, C, H, W), dtype=jnp.float32)
    target = (jax.random.uniform(k2, (B, C, H, W)) > 0.5).astype(jnp.float32)

    loss = jax.block_until_ready(dice_loss(predict, target, smooth=1.0))
    ref = jax.block_until_ready(dice_loss_ref(predict, target, smooth=1.0))
    assert jnp.allclose(loss, ref, rtol=1e-5, atol=1e-5), (loss, ref)

    # Ragged case (n not a multiple of 1024) exercising the masked-tail path.
    predict2 = jax.random.normal(k3, (1, 3, 17, 19), dtype=jnp.float32)
    target2 = (jax.random.uniform(k4, (1, 3, 17, 19)) > 0.5).astype(jnp.float32)
    loss2 = jax.block_until_ready(dice_loss(predict2, target2, smooth=1.0))
    ref2 = jax.block_until_ready(dice_loss_ref(predict2, target2, smooth=1.0))
    assert jnp.allclose(loss2, ref2, rtol=1e-5, atol=1e-5), (loss2, ref2)

    print("KERNEL_OK")
</pallas_src>

<mosaic_0001>
module attributes {stable_mosaic.version = 11 : i64} {
  func.func @_dice_partials_kernel(%arg0: i32, %arg1: memref<16x128xf32, #tpu.memory_space<vmem>>, %arg2: memref<16x128xf32, #tpu.memory_space<vmem>>, %arg3: memref<1x3xf32, #tpu.memory_space<smem>>, %arg4: memref<3x8x128xf32, #tpu.memory_space<vmem>>) attributes {dimension_semantics = [#tpu.dimension_semantics<arbitrary>], iteration_bounds = array<i64: 1>, scalar_prefetch = 0 : i64, scratch_operands = 1 : i64, tpu.core_type = #tpu.core_type<tc>, window_params = [{transform_indices = @transform_0, window_bounds = array<i64: 16, 128>}, {transform_indices = @transform_1, window_bounds = array<i64: 16, 128>}, {transform_indices = @transform_2, window_bounds = array<i64: 1, 3>}]} {
    %c0_i32 = arith.constant 0 : i32
    %0 = arith.cmpi eq, %arg0, %c0_i32 : i32
    %1 = arith.extui %0 : i1 to i32
    %c0_i32_0 = arith.constant 0 : i32
    %2 = arith.cmpi ne, %1, %c0_i32_0 : i32
    scf.if %2 {
      %cst_25 = arith.constant 0.000000e+00 : f32
      %37 = vector.broadcast %cst_25 : f32 to vector<3x8x128xf32>
      %c0_26 = arith.constant 0 : index
      %c0_27 = arith.constant 0 : index
      %c0_28 = arith.constant 0 : index
      %38 = vector.load %arg4[%c0_26, %c0_27, %c0_28] : memref<3x8x128xf32, #tpu.memory_space<vmem>>, vector<3x8x128xf32>
      tpu.vector_store %arg4[%c0_26, %c0_27, %c0_28], %37 {strides = array<i32>} : memref<3x8x128xf32, #tpu.memory_space<vmem>>, vector<3x8x128xf32>,
    } else {
    }
    %c0 = arith.constant 0 : index
    %c0_1 = arith.constant 0 : index
    %3 = vector.load %arg1[%c0, %c0_1] : memref<16x128xf32, #tpu.memory_space<vmem>>, vector<16x128xf32>
    %4 = arith.negf %3 : vector<16x128xf32>
    %5 = math.exp %4 : vector<16x128xf32>
    %cst = arith.constant 1.000000e+00 : f32
    %6 = vector.broadcast %cst : f32 to vector<16x128xf32>
    %7 = arith.addf %6, %5 : vector<16x128xf32>
    %8 = arith.divf %6, %7 : vector<16x128xf32>
    %c0_2 = arith.constant 0 : index
    %c0_3 = arith.constant 0 : index
    %9 = vector.load %arg2[%c0_2, %c0_3] : memref<16x128xf32, #tpu.memory_space<vmem>>, vector<16x128xf32>
    %10 = vector.shape_cast %8 : vector<16x128xf32> to vector<2x8x128xf32>
    %11 = vector.shape_cast %9 : vector<16x128xf32> to vector<2x8x128xf32>
    %c0_4 = arith.constant 0 : index
    %c0_5 = arith.constant 0 : index
    %c0_6 = arith.constant 0 : index
    %12 = vector.load %arg4[%c0_4, %c0_5, %c0_6] : memref<3x8x128xf32, #tpu.memory_space<vmem>>, vector<1x8x128xf32>
    %13 = vector.shape_cast %12 : vector<1x8x128xf32> to vector<8x128xf32>
    %14 = arith.mulf %10, %11 : vector<2x8x128xf32>
    %cst_7 = arith.constant dense<0.000000e+00> : vector<8x128xf32>
    %15 = vector.multi_reduction <add>, %14, %cst_7 [0] : vector<2x8x128xf32> to vector<8x128xf32>
    %16 = arith.addf %13, %15 : vector<8x128xf32>
    %c0_8 = arith.constant 0 : index
    %c0_9 = arith.constant 0 : index
    %c0_10 = arith.constant 0 : index
    %17 = vector.load %arg4[%c0_8, %c0_9, %c0_10] : memref<3x8x128xf32, #tpu.memory_space<vmem>>, vector<1x8x128xf32>
    %18 = vector.shape_cast %17 : vector<1x8x128xf32> to vector<8x128xf32>
    %19 = vector.shape_cast %16 : vector<8x128xf32> to vector<1x8x128xf32>
    tpu.vector_store %arg4[%c0_8, %c0_9, %c0_10], %19 {strides = array<i32>} : memref<3x8x128xf32, #tpu.memory_space<vmem>>, vector<1x8x128xf32>,
    %c1 = arith.constant 1 : index
    %c0_11 = arith.constant 0 : index
    %c0_12 = arith.constant 0 : index
    %20 = vector.load %arg4[%c1, %c0_11, %c0_12] : memref<3x8x128xf32, #tpu.memory_space<vmem>>, vector<1x8x128xf32>
    %21 = vector.shape_cast %20 : vector<1x8x128xf32> to vector<8x128xf32>
    %cst_13 = arith.constant dense<0.000000e+00> : vector<8x128xf32>
    %22 = vector.multi_reduction <add>, %10, %cst_13 [0] : vector<2x8x128xf32> to vector<8x128xf32>
    %23 = arith.addf %21, %22 : vector<8x128xf32>
    %c1_14 = arith.constant 1 : index
    %c0_15 = arith.constant 0 : index
    %c0_16 = arith.constant 0 : index
    %24 = vector.load %arg4[%c1_14, %c0_15, %c0_16] : memref<3x8x128xf32, #tpu.memory_space<vmem>>, vector<1x8x128xf32>
    %25 = vector.shape_cast %24 : vector<1x8x128xf32> to vector<8x128xf32>
    %26 = vector.shape_cast %23 : vector<8x128xf32> to vector<1x8x128xf32>
    tpu.vector_store %arg4[%c1_14, %c0_15, %c0_16], %26 {strides = array<i32>} : memref<3x8x128xf32, #tpu.memory_space<vmem>>, vector<1x8x128xf32>,
    %c2 = arith.constant 2 : index
    %c0_17 = arith.constant 0 : index
    %c0_18 = arith.constant 0 : index
    %27 = vector.load %arg4[%c2, %c0_17, %c0_18] : memref<3x8x128xf32, #tpu.memory_space<vmem>>, vector<1x8x128xf32>
    %28 = vector.shape_cast %27 : vector<1x8x128xf32> to vector<8x128xf32>
    %cst_19 = arith.constant dense<0.000000e+00> : vector<8x128xf32>
    %29 = vector.multi_reduction <add>, %11, %cst_19 [0] : vector<2x8x128xf32> to vector<8x128xf32>
    %30 = arith.addf %28, %29 : vector<8x128xf32>
    %c2_20 = arith.constant 2 : index
    %c0_21 = arith.constant 0 : index
    %c0_22 = arith.constant 0 : index
    %31 = vector.load %arg4[%c2_20, %c0_21, %c0_22] : memref<3x8x128xf32, #tpu.memory_space<vmem>>, vector<1x8x128xf32>
    %32 = vector.shape_cast %31 : vector<1x8x128xf32> to vector<8x128xf32>
    %33 = vector.shape_cast %30 : vector<8x128xf32> to vector<1x8x128xf32>
    tpu.vector_store %arg4[%c2_20, %c0_21, %c0_22], %33 {strides = array<i32>} : memref<3x8x128xf32, #tpu.memory_space<vmem>>, vector<1x8x128xf32>,
    %c0_i32_23 = arith.constant 0 : i32
    %34 = arith.cmpi eq, %arg0, %c0_i32_23 : i32
    %35 = arith.extui %34 : i1 to i32
    %c0_i32_24 = arith.constant 0 : i32
    %36 = arith.cmpi ne, %35, %c0_i32_24 : i32
    scf.if %36 {
      %c0_25 = arith.constant 0 : index
      %c0_26 = arith.constant 0 : index
      %c0_27 = arith.constant 0 : index
      %37 = vector.load %arg4[%c0_25, %c0_26, %c0_27] : memref<3x8x128xf32, #tpu.memory_space<vmem>>, vector<1x8x128xf32>
      %38 = vector.shape_cast %37 : vector<1x8x128xf32> to vector<8x128xf32>
      %39 = vector.shape_cast %38 : vector<8x128xf32> to vector<1x8x128xf32>
      %cst_28 = arith.constant dense<0.000000e+00> : vector<1xf32>
      %40 = vector.multi_reduction <add>, %39, %cst_28 [1, 2] : vector<1x8x128xf32> to vector<1xf32>
      %41 = vector.shape_cast %40 : vector<1xf32> to vector<1x1x1xf32>
      %42 = vector.extract %41[0, 0, 0] : f32 from vector<1x1x1xf32>
      %c0_29 = arith.constant 0 : index
      %c0_30 = arith.constant 0 : index
      %43 = memref.load %arg3[%c0_29, %c0_30] : memref<1x3xf32, #tpu.memory_space<smem>>
      memref.store %42, %arg3[%c0_29, %c0_30] : memref<1x3xf32, #tpu.memory_space<smem>>
      %c1_31 = arith.constant 1 : index
      %c0_32 = arith.constant 0 : index
      %c0_33 = arith.constant 0 : index
      %44 = vector.load %arg4[%c1_31, %c0_32, %c0_33] : memref<3x8x128xf32, #tpu.memory_space<vmem>>, vector<1x8x128xf32>
      %45 = vector.shape_cast %44 : vector<1x8x128xf32> to vector<8x128xf32>
      %46 = vector.shape_cast %45 : vector<8x128xf32> to vector<1x8x128xf32>
      %cst_34 = arith.constant dense<0.000000e+00> : vector<1xf32>
      %47 = vector.multi_reduction <add>, %46, %cst_34 [1, 2] : vector<1x8x128xf32> to vector<1xf32>
      %48 = vector.shape_cast %47 : vector<1xf32> to vector<1x1x1xf32>
      %49 = vector.extract %48[0, 0, 0] : f32 from vector<1x1x1xf32>
      %c0_35 = arith.constant 0 : index
      %c1_36 = arith.constant 1 : index
      %50 = memref.load %arg3[%c0_35, %c1_36] : memref<1x3xf32, #tpu.memory_space<smem>>
      memref.store %49, %arg3[%c0_35, %c1_36] : memref<1x3xf32, #tpu.memory_space<smem>>
      %c2_37 = arith.constant 2 : index
      %c0_38 = arith.constant 0 : index
      %c0_39 = arith.constant 0 : index
      %51 = vector.load %arg4[%c2_37, %c0_38, %c0_39] : memref<3x8x128xf32, #tpu.memory_space<vmem>>, vector<1x8x128xf32>
      %52 = vector.shape_cast %51 : vector<1x8x128xf32> to vector<8x128xf32>
      %53 = vector.shape_cast %52 : vector<8x128xf32> to vector<1x8x128xf32>
      %cst_40 = arith.constant dense<0.000000e+00> : vector<1xf32>
      %54 = vector.multi_reduction <add>, %53, %cst_40 [1, 2] : vector<1x8x128xf32> to vector<1xf32>
      %55 = vector.shape_cast %54 : vector<1xf32> to vector<1x1x1xf32>
      %56 = vector.extract %55[0, 0, 0] : f32 from vector<1x1x1xf32>
      %c0_41 = arith.constant 0 : index
      %c2_42 = arith.constant 2 : index
      %57 = memref.load %arg3[%c0_41, %c2_42] : memref<1x3xf32, #tpu.memory_space<smem>>
      memref.store %56, %arg3[%c0_41, %c2_42] : memref<1x3xf32, #tpu.memory_space<smem>>
    } else {
    }
    return
  }
  func.func @transform_0(%arg0: i32) -> (i32, i32) {
    %c0_i32 = arith.constant 0 : i32
    %c0_i32_0 = arith.constant 0 : i32
    return %arg0, %c0_i32 : i32, i32
  }
  func.func @transform_1(%arg0: i32) -> (i32, i32) {
    %c0_i32 = arith.constant 0 : i32
    %c0_i32_0 = arith.constant 0 : i32
    return %arg0, %c0_i32 : i32, i32
  }
  func.func @transform_2(%arg0: i32) -> (i32, i32) {
    %c0_i32 = arith.constant 0 : i32
    %c0_i32_0 = arith.constant 0 : i32
    %c0_i32_1 = arith.constant 0 : i32
    return %c0_i32, %c0_i32_0 : i32, i32
  }
}

</mosaic_0001>

<bundles_post_ra>
// kernel: tpu_custom_call.1
= control target key start
LH: loop header
LB: loop body
LE: loop exit
PB: predicated region body
PF: predicated region fallthrough
CT: control target
= control target key end

     0   :  { %7 = vsyncpa [#allocation4], 0  ;;  %s281_s0 = inlined_call_operand.hbm [shape: f32[16,128], index: 0, kind: input, shape index: {}]   ;;  %s282_s1 = inlined_call_operand.hbm [shape: f32[16,128], index: 1, kind: input, shape index: {}]   ;;  %s283_s2 = inlined_call_operand.hbm [shape: f32[1,3], index: 2, kind: output, shape index: {}]  }
   0x1   :  { %8 = vsyncpa [#allocation7], 0 }
   0x2   :  { %9 = vsyncpa [#allocation5], 0  ;;  %s14_s11 = sshll.u32 %s281_s0, 4  ;;  %s252_s12 = smov [#allocation3]   ;;  %s15_s11 = int_to_ptr.hbm [resolvable:$true] %s14_s11 }
   0x3   :  { %s16_s13 = sshll.u32 %s252_s12, 4  ;;  %s27_s16 = sshll.u32 %s282_s1, 4  ;;  %s17_s13 = int_to_ptr.vmem [resolvable:$true] %s16_s13  ;;  %s28_s16 = int_to_ptr.hbm [resolvable:$true] %s27_s16 }
   0x4   :  { %s253_s17 = smov 128   ;;  %s254_s18 = smov 8  }
   0x5   :  { %22 = dma.hbm_to_vmem [thread:$0]  %s15_s11, 256, %s17_s13, [#allocation4], %s253_s17, %s253_s17, %s254_s18  }
   0x6   :  { %s255_s19 = smov [#allocation6]  }
   0x7   :  { %s29_s20 = sshll.u32 %s255_s19, 4  ;;  %s30_s20 = int_to_ptr.vmem [resolvable:$true] %s29_s20 }
   0x8   :  { %35 = dma.hbm_to_vmem [thread:$0]  %s28_s16, 256, %s30_s20, [#allocation7], %s253_s17, %s253_s17, %s254_s18  }
   0x9   :  { %246 = dma.done.wait [#allocation4], 256  }
   0xa   :  { %247 = vsyncadd [#allocation4], 4294967040 }
   0xb   :  { %248 = dma.done.wait [#allocation7], 256  }
   0xc   :  { %249 = vsyncadd [#allocation7], 4294967040  ;;  %v51_v0 = vld [vmem:[#allocation3] sm:$0xff]  ;;  %v52_v1 = vld [vmem:[#allocation3 + $0x8] sm:$0xff]  ;;  %s153_s22 = sshll.u32 %s283_s2, 4  ;;  %s256_s25 = smov [#allocation8]   ;;  %s154_s22 = int_to_ptr.hbm [resolvable:$true] %s153_s22 }
   0xd   :  { %v165_v2 = vmul.f32 -1.442695, %v51_v0  ;;  %v166_v3 = vmul.f32 -1.442695, %v52_v1  ;;  %v91_v4 = vld [vmem:[#allocation6] sm:$0xff]  ;;  %v92_v5 = vld [vmem:[#allocation6 + $0x8] sm:$0xff] }
   0xe   :  { %v106_v6 = vadd.f32 %v92_v5, %v91_v4 }
   0xf   :  { %178 = vpow2.f32 %v165_v2 }
  0x10   :  { %180 = vpow2.f32 %v166_v3  ;;  %137 = vadd.xlane.f32.xlu1 %v106_v6 }
  0x15   :  { %v179_v7 = vpop.eup %178 }
  0x16   :  { %v181_v8 = vpop.eup %180  ;;  %v59_v9 = vadd.f32 1.0, %v179_v7 }
  0x17   :  { %v60_v10 = vadd.f32 1.0, %v181_v8 }
  0x18   :  { %182 = vrcp.f32 %v59_v9  ;;  %vm66_vm0 = vweird.f32 %v59_v9  ;;  %v72_v14 = vand.u32 2147483648, %v59_v9  ;;  %v70_v17 = vand.u32 2147483647, %v59_v9 }
  0x19   :  { %184 = vrcp.f32 %v60_v10  ;;  %v87_v18 = vand.u32 2147483648, %v60_v10  ;;  %vm81_vm2 = vweird.f32 %v60_v10  ;;  %v85_v20 = vand.u32 2147483647, %v60_v10 }
  0x1a   :  { %v73_v22 = vor.u32 1.1754944e-38, %v72_v14  ;;  %vm71_vm5 = vcmp.eq.f32.partialorder %v70_v17, 8.507059e+37 }
  0x1b   :  { %v88_v25 = vor.u32 1.1754944e-38, %v87_v18  ;;  %vm86_vm7 = vcmp.eq.f32.partialorder %v85_v20, 8.507059e+37 }
  0x1e   :  { %v183_v11 = vpop.eup %182 }
  0x1f   :  { %v185_v12 = vpop.eup %184  ;;  %v62_v13 = vmul.f32 %v183_v11, %v59_v9  ;;  %vm67_vm1 = vweird.f32 %v183_v11 }
  0x20   :  { %v77_v15 = vmul.f32 %v185_v12, %v60_v10  ;;  %vm82_vm3 = vweird.f32 %v185_v12  ;;  %vm68_vm4 = vmor %vm66_vm0, %vm67_vm1 }
  0x21   :  { %v63_v16 = vsub.f32 1.0, %v62_v13  ;;  %vm83_vm6 = vmor %vm81_vm2, %vm82_vm3 }
  0x22   :  { %v78_v19 = vsub.f32 1.0, %v77_v15 }
  0x23   :  { %v64_v21 = vmul.f32 %v183_v11, %v63_v16 }
  0x24   :  { %v79_v23 = vmul.f32 %v185_v12, %v78_v19 }
  0x25   :  { %v65_v24 = vadd.f32 %v183_v11, %v64_v21 }
  0x26   :  { %v80_v26 = vadd.f32 %v185_v12, %v79_v23 }
  0x27   :  { %v69_v27 = vsel %vm68_vm4, %v183_v11, %v65_v24 }
  0x28   :  { %v74_v28 = vsel %vm71_vm5, %v73_v22, %v69_v27  ;;  %v84_v29 = vsel %vm83_vm6, %v185_v12, %v80_v26 }
  0x29   :  { %v89_v30 = vsel %vm86_vm7, %v88_v25, %v84_v29  ;;  %v94_v31 = vmul.f32 %v91_v4, %v74_v28 }
  0x2a   :  { %v95_v32 = vmul.f32 %v92_v5, %v89_v30  ;;  %v101_v34 = vadd.f32 %v89_v30, %v74_v28 }
  0x2c   :  { %v96_v33 = vadd.f32 %v95_v32, %v94_v31 }
  0x2e   :  { %113 = vadd.xlane.f32.xlu0 %v96_v33 }
  0x36   :  { %125 = vadd.xlane.f32.xlu0 %v101_v34 }
  0x83   :  { %v138_v35 = vpop.xlane.xlu1 %137 }
  0x84   :  { %v139_v37 = vrot.slane %v138_v35, 4 }
  0x86   :  { %v140_v40 = vadd.f32 %v139_v37, %v138_v35 }
  0x88   :  { %v141_v43 = vrot.slane %v140_v40, 2 }
  0x8a   :  { %v142_v49 = vadd.f32 %v141_v43, %v140_v40 }
  0x8c   :  { %v143_v52 = vrot.slane %v142_v49, 1 }
  0x8e   :  { %v144_v55 = vadd.f32 %v143_v52, %v142_v49 }
  0xa1   :  { %v114_v36 = vpop.xlane.xlu0 %113 }
  0xa2   :  { %v115_v38 = vrot.slane %v114_v36, 4 }
  0xa4   :  { %v116_v39 = vadd.f32 %v115_v38, %v114_v36 }
  0xa6   :  { %v117_v41 = vrot.slane %v116_v39, 2 }
  0xa8   :  { %v118_v42 = vadd.f32 %v117_v41, %v116_v39 }
  0xa9   :  { %v126_v44 = vpop.xlane.xlu0 %125 }
  0xaa   :  { %v127_v45 = vrot.slane %v126_v44, 4  ;;  %v119_v46 = vrot.slane %v118_v42, 1 }
  0xac   :  { %v128_v47 = vadd.f32 %v127_v45, %v126_v44  ;;  %v120_v48 = vadd.f32 %v119_v46, %v118_v42 }
  0xae   :  { %v129_v50 = vrot.slane %v128_v47, 2  ;;  %167 = vpush %v120_v48 }
  0xb0   :  { %v130_v51 = vadd.f32 %v129_v50, %v128_v47 }
  0xb2   :  { %v131_v53 = vrot.slane %v130_v51, 1 }
  0xb4   :  { %v132_v54 = vadd.f32 %v131_v53, %v130_v51 }
  0xb6   :  { %169 = vpush %v132_v54 }
  0xb7   :  { %171 = vpush %v144_v55 }
  0xdf   :  { %s168_s0 = spop %167 }
  0xe0   :  { %123 = sst [smem:[#allocation8]] %s168_s0 }
  0xe7   :  { %s170_s23 = spop %169 }
  0xe8   :  { %135 = sst [smem:[#allocation8 + $0x1]] %s170_s23  ;;  %s172_s24 = spop %171 }
  0xe9   :  { %147 = sst [smem:[#allocation8 + $0x2]] %s172_s24 }
  0xea   :  { %156 = dma.smem_to_hbm %s256_s25, 16, %s154_s22, [#allocation5]  }
  0xeb   :  { %250 = dma.done.wait [#allocation5], 16  }
  0xec   :  { %251 = vsyncadd [#allocation5], 4294967280 }
  0xed   :  { %161 = sfence }
  0xee   :  { %162 = vsyncpa [#allocation4], 1 }
  0xef   :  { %163 = vsyncpa [#allocation7], 1 }
  0xf0   :  { %164 = vsyncpa [#allocation5], 1 }

</bundles_post_ra>
